<compile_context>
chip_gen: v7x
topology: tpu7x:2x2x1
jax: 0.10.0
libtpu: 0.0.40
codegen_flags: <defaults>
</compile_context>

<pallas_src>
import jax
import jax.numpy as jnp
from jax import lax
from jax.experimental import pallas as pl
from jax.experimental.pallas import tpu as pltpu

EPS = 1e-12  # torch.nn.functional.normalize default eps


def _l2_normalize(x):
    # F.normalize(x, dim=1, p=2): x / max(||x||_2, eps)
    # 1/max(sqrt(ss), eps) == rsqrt(max(ss, eps^2))  (sqrt is monotone), so the
    # zero-vector behavior of the torch reference is preserved exactly.
    sumsq = jnp.sum(x * x, axis=1, keepdims=True)
    inv = lax.rsqrt(jnp.maximum(sumsq, EPS * EPS))
    return x * inv


def _make_proto_kernel(T, num_iters):
    inv_T = 1.0 / T

    def kernel(s_ref, t_ref, w1_ref, b1_ref, w2_ref, b2_ref, cw_ref, loss_ref):
        s = s_ref[...]
        t = t_ref[...]
        B = s.shape[0]

        # --- normalize prototype matrix C (rows) ---
        C = _l2_normalize(cw_ref[...])                      # (P, D)
        P = C.shape[0]

        # --- predictor MLP on s: Linear -> ReLU -> Linear ---
        h = jnp.dot(s, w1_ref[...], preferred_element_type=jnp.float32) + b1_ref[...]
        h = jnp.maximum(h, 0.0)
        s_pred = jnp.dot(h, w2_ref[...], preferred_element_type=jnp.float32) + b2_ref[...]

        # --- stack s_pred and t, normalize once, single fused score matmul ---
        z = jnp.concatenate([s_pred, t], axis=0)            # (2B, D)
        zn = _l2_normalize(z)                               # (2B, D)
        # z @ C^T without materializing a transpose (contract last dims).
        scores = lax.dot_general(
            zn, C,
            dimension_numbers=(((1,), (1,)), ((), ())),
            preferred_element_type=jnp.float32,
        )                                                   # (2B, P)
        scores_s = scores[:B, :]                            # (B, P)
        scores_t = scores[B:, :]                            # (B, P)

        # --- log_softmax(scores_s / T, dim=1) ---
        logits = scores_s * inv_T
        logits = logits - jnp.max(logits, axis=1, keepdims=True)
        log_p_s = logits - jnp.log(jnp.sum(jnp.exp(logits), axis=1, keepdims=True))

        # --- sinkhorn(scores_t), computed directly in (B, P) layout ---
        # M[b, p] corresponds to torch's Q[p, b]; row/col roles swap so no
        # transposes are needed and the returned Q.T is just M.
        # TODO(synk): torch remove_infs() (replace inf with finite max) omitted;
        # exp() here cannot overflow after the global-max subtraction.
        M = scores_t * inv_T
        M = jnp.exp(M - jnp.max(M))                         # (B, P)
        M = M / jnp.sum(M)                                  # global normalization
        r = 1.0 / P
        c = 1.0 / B
        for it in range(num_iters):                         # fixed 3 iters, unrolled
            # torch: u = r / Q.sum(dim=1); Q *= u[:, None]   -> column scaling here
            col_sum = jnp.sum(M, axis=0, keepdims=True)     # (1, P)
            M = M * (r * pl.reciprocal(col_sum, approx=True))
            # torch: Q *= (c / Q.sum(dim=0))[None, :]        -> row scaling here
            row_sum = jnp.sum(M, axis=1, keepdims=True)     # (B, 1)
            if it + 1 == num_iters:
                # Fold the final Q / Q.sum(dim=0, keepdim=True) into this step:
                # after scaling by c/row_sum every row sums to c, so dividing by
                # the (re-computed) row sum is equivalent to dropping the c
                # factor here. Saves one XLU reduction + divide.
                M = M * pl.reciprocal(row_sum, approx=True)
            else:
                M = M * (c * pl.reciprocal(row_sum, approx=True))
        q_t = M                                             # (B, P)

        # --- loss = -(q_t * log_p_s).sum(dim=1).mean() ---
        loss = -jnp.sum(q_t * log_p_s) * (1.0 / B)
        loss_ref[0, 0] = loss

    return kernel


def proto_forward(s, t, params, *, T=0.1, num_iters=3):
    w1, b1, w2, b2, proto_w = params
    B, D = s.shape
    Pd = w1.shape[1]
    P = proto_w.shape[0]

    kernel = _make_proto_kernel(T, num_iters)
    vmem = pl.BlockSpec(memory_space=pltpu.MemorySpace.VMEM)

    # Advisory scheduling hint for XLA.
    flops = (
        2 * B * D * Pd + 2 * B * Pd * D      # predictor MLP matmuls
        + 2 * (2 * B) * D * P                # fused prototype-score matmul
        + 12 * B * P + 8 * B * D + 3 * P * D  # normalize / softmax / sinkhorn (elementwise+reduce, rough)
    )
    transcendentals = 2 * B * P + B + (2 * B + P) + (num_iters + 1) * (B + P)
    bytes_accessed = 4 * (
        s.size + t.size + w1.size + b1.size + w2.size + b2.size + proto_w.size + 1
    )

    loss = pl.pallas_call(
        kernel,
        out_shape=jax.ShapeDtypeStruct((1, 1), jnp.float32),
        in_specs=[vmem] * 7,
        out_specs=pl.BlockSpec(memory_space=pltpu.MemorySpace.SMEM),
        cost_estimate=pl.CostEstimate(
            flops=flops,
            transcendentals=transcendentals,
            bytes_accessed=bytes_accessed,
        ),
    )(s, t, w1, b1, w2, b2, proto_w)
    return loss[0, 0]


def init_params(key, proj_dim, pred_dim, num_protos):
    k1, k2, k3 = jax.random.split(key, 3)
    # deterministic scaled-normal init (stands in for utils.weight_init)
    w1 = jax.random.normal(k1, (proj_dim, pred_dim), jnp.float32) / jnp.sqrt(proj_dim)
    b1 = jnp.zeros((1, pred_dim), jnp.float32)
    w2 = jax.random.normal(k2, (pred_dim, proj_dim), jnp.float32) / jnp.sqrt(pred_dim)
    b2 = jnp.zeros((1, proj_dim), jnp.float32)
    proto_w = jax.random.normal(k3, (num_protos, proj_dim), jnp.float32) / jnp.sqrt(proj_dim)
    return (w1, b1, w2, b2, proto_w)


if __name__ == "__main__":
    B = 8
    proj_dim = 32
    pred_dim = 64
    num_protos = 16
    T = 0.1

    key = jax.random.PRNGKey(0)
    ks, kt, kp = jax.random.split(key, 3)
    s = jax.random.normal(ks, (B, proj_dim), jnp.float32)
    t = jax.random.normal(kt, (B, proj_dim), jnp.float32)
    params = init_params(kp, proj_dim, pred_dim, num_protos)

    loss = proto_forward(s, t, params, T=T, num_iters=3)
    loss = jax.block_until_ready(loss)
    assert jnp.isfinite(loss), f"non-finite loss: {loss}"
    print("KERNEL_OK")
</pallas_src>

<mosaic_0001>
module attributes {stable_mosaic.version = 11 : i64} {
  func.func @kernel(%arg0: memref<8x32xf32, #tpu.memory_space<vmem>>, %arg1: memref<8x32xf32, #tpu.memory_space<vmem>>, %arg2: memref<32x64xf32, #tpu.memory_space<vmem>>, %arg3: memref<1x64xf32, #tpu.memory_space<vmem>>, %arg4: memref<64x32xf32, #tpu.memory_space<vmem>>, %arg5: memref<1x32xf32, #tpu.memory_space<vmem>>, %arg6: memref<16x32xf32, #tpu.memory_space<vmem>>, %arg7: memref<1x1xf32, #tpu.memory_space<smem>>) attributes {dimension_semantics = [], scalar_prefetch = 0 : i64, scratch_operands = 0 : i64, tpu.core_type = #tpu.core_type<tc>} {
    %c0 = arith.constant 0 : index
    %c0_0 = arith.constant 0 : index
    %0 = vector.load %arg0[%c0, %c0_0] : memref<8x32xf32, #tpu.memory_space<vmem>>, vector<8x32xf32>
    %c0_1 = arith.constant 0 : index
    %c0_2 = arith.constant 0 : index
    %1 = vector.load %arg1[%c0_1, %c0_2] : memref<8x32xf32, #tpu.memory_space<vmem>>, vector<8x32xf32>
    %c0_3 = arith.constant 0 : index
    %c0_4 = arith.constant 0 : index
    %2 = vector.load %arg6[%c0_3, %c0_4] : memref<16x32xf32, #tpu.memory_space<vmem>>, vector<16x32xf32>
    %3 = arith.mulf %2, %2 : vector<16x32xf32>
    %cst = arith.constant dense<0.000000e+00> : vector<16xf32>
    %4 = vector.multi_reduction <add>, %3, %cst [1] : vector<16x32xf32> to vector<16xf32>
    %5 = vector.shape_cast %4 : vector<16xf32> to vector<16x1xf32>
    %cst_5 = arith.constant 1.000000e-24 : f32
    %6 = vector.broadcast %cst_5 : f32 to vector<16x1xf32>
    %7 = arith.maximumf %5, %6 : vector<16x1xf32>
    %8 = math.rsqrt %7 : vector<16x1xf32>
    %9 = vector.broadcast %8 : vector<16x1xf32> to vector<16x32xf32>
    %10 = arith.mulf %2, %9 : vector<16x32xf32>
    %c0_6 = arith.constant 0 : index
    %c0_7 = arith.constant 0 : index
    %11 = vector.load %arg2[%c0_6, %c0_7] : memref<32x64xf32, #tpu.memory_space<vmem>>, vector<32x64xf32>
    %cst_8 = arith.constant dense<0.000000e+00> : vector<8x64xf32>
    %12 = tpu.matmul %0, %11, %cst_8 {dimension_numbers = #tpu.dot_dimension_numbers<[1], [0], [0], [1], [0, 0, 1, 1], [], []>} : vector<8x32xf32>, vector<32x64xf32>, vector<8x64xf32> -> vector<8x64xf32>
    %c0_9 = arith.constant 0 : index
    %c0_10 = arith.constant 0 : index
    %13 = vector.load %arg3[%c0_9, %c0_10] : memref<1x64xf32, #tpu.memory_space<vmem>>, vector<1x64xf32>
    %14 = vector.broadcast %13 : vector<1x64xf32> to vector<8x64xf32>
    %15 = arith.addf %12, %14 : vector<8x64xf32>
    %cst_11 = arith.constant 0.000000e+00 : f32
    %16 = vector.broadcast %cst_11 : f32 to vector<8x64xf32>
    %17 = arith.maximumf %15, %16 : vector<8x64xf32>
    %c0_12 = arith.constant 0 : index
    %c0_13 = arith.constant 0 : index
    %18 = vector.load %arg4[%c0_12, %c0_13] : memref<64x32xf32, #tpu.memory_space<vmem>>, vector<64x32xf32>
    %cst_14 = arith.constant dense<0.000000e+00> : vector<8x32xf32>
    %19 = tpu.matmul %17, %18, %cst_14 {dimension_numbers = #tpu.dot_dimension_numbers<[1], [0], [0], [1], [0, 0, 1, 1], [], []>} : vector<8x64xf32>, vector<64x32xf32>, vector<8x32xf32> -> vector<8x32xf32>
    %c0_15 = arith.constant 0 : index
    %c0_16 = arith.constant 0 : index
    %20 = vector.load %arg5[%c0_15, %c0_16] : memref<1x32xf32, #tpu.memory_space<vmem>>, vector<1x32xf32>
    %21 = vector.broadcast %20 : vector<1x32xf32> to vector<8x32xf32>
    %22 = arith.addf %19, %21 : vector<8x32xf32>
    %23 = tpu.concatenate %22, %1 in 0 : vector<8x32xf32>, vector<8x32xf32> -> vector<16x32xf32>
    %24 = arith.mulf %23, %23 : vector<16x32xf32>
    %cst_17 = arith.constant dense<0.000000e+00> : vector<16xf32>
    %25 = vector.multi_reduction <add>, %24, %cst_17 [1] : vector<16x32xf32> to vector<16xf32>
    %26 = vector.shape_cast %25 : vector<16xf32> to vector<16x1xf32>
    %cst_18 = arith.constant 1.000000e-24 : f32
    %27 = vector.broadcast %cst_18 : f32 to vector<16x1xf32>
    %28 = arith.maximumf %26, %27 : vector<16x1xf32>
    %29 = math.rsqrt %28 : vector<16x1xf32>
    %30 = vector.broadcast %29 : vector<16x1xf32> to vector<16x32xf32>
    %31 = arith.mulf %23, %30 : vector<16x32xf32>
    %cst_19 = arith.constant dense<0.000000e+00> : vector<16x16xf32>
    %32 = tpu.matmul %31, %10, %cst_19 {dimension_numbers = #tpu.dot_dimension_numbers<[1], [1], [0], [0], [0, 0, 1, 0], [], []>} : vector<16x32xf32>, vector<16x32xf32>, vector<16x16xf32> -> vector<16x16xf32>
    %33 = vector.extract_strided_slice %32 {offsets = [0, 0], sizes = [8, 16], strides = [1, 1]} : vector<16x16xf32> to vector<8x16xf32>
    %34 = vector.extract_strided_slice %32 {offsets = [8, 0], sizes = [8, 16], strides = [1, 1]} : vector<16x16xf32> to vector<8x16xf32>
    %cst_20 = arith.constant 1.000000e+01 : f32
    %35 = vector.broadcast %cst_20 : f32 to vector<8x16xf32>
    %36 = arith.mulf %33, %35 : vector<8x16xf32>
    %cst_21 = arith.constant dense<0xFF800000> : vector<8xf32>
    %37 = vector.multi_reduction <maximumf>, %36, %cst_21 [1] : vector<8x16xf32> to vector<8xf32>
    %38 = vector.shape_cast %37 : vector<8xf32> to vector<8x1xf32>
    %39 = vector.broadcast %38 : vector<8x1xf32> to vector<8x16xf32>
    %40 = arith.subf %36, %39 : vector<8x16xf32>
    %41 = math.exp %40 : vector<8x16xf32>
    %cst_22 = arith.constant dense<0.000000e+00> : vector<8xf32>
    %42 = vector.multi_reduction <add>, %41, %cst_22 [1] : vector<8x16xf32> to vector<8xf32>
    %43 = vector.shape_cast %42 : vector<8xf32> to vector<8x1xf32>
    %44 = math.log %43 : vector<8x1xf32>
    %45 = vector.broadcast %44 : vector<8x1xf32> to vector<8x16xf32>
    %46 = arith.subf %40, %45 : vector<8x16xf32>
    %cst_23 = arith.constant 1.000000e+01 : f32
    %47 = vector.broadcast %cst_23 : f32 to vector<8x16xf32>
    %48 = arith.mulf %34, %47 : vector<8x16xf32>
    %49 = vector.shape_cast %48 : vector<8x16xf32> to vector<1x8x16xf32>
    %cst_24 = arith.constant dense<0xFF800000> : vector<1xf32>
    %50 = vector.multi_reduction <maximumf>, %49, %cst_24 [1, 2] : vector<1x8x16xf32> to vector<1xf32>
    %51 = vector.shape_cast %50 : vector<1xf32> to vector<1x1x1xf32>
    %52 = vector.extract %51[0, 0, 0] : f32 from vector<1x1x1xf32>
    %53 = vector.broadcast %52 : f32 to vector<8x16xf32>
    %54 = arith.subf %48, %53 : vector<8x16xf32>
    %55 = math.exp %54 : vector<8x16xf32>
    %56 = vector.shape_cast %55 : vector<8x16xf32> to vector<1x8x16xf32>
    %cst_25 = arith.constant dense<0.000000e+00> : vector<1xf32>
    %57 = vector.multi_reduction <add>, %56, %cst_25 [1, 2] : vector<1x8x16xf32> to vector<1xf32>
    %58 = vector.shape_cast %57 : vector<1xf32> to vector<1x1x1xf32>
    %59 = vector.extract %58[0, 0, 0] : f32 from vector<1x1x1xf32>
    %60 = vector.broadcast %59 : f32 to vector<8x16xf32>
    %61 = arith.divf %55, %60 : vector<8x16xf32>
    %cst_26 = arith.constant dense<0.000000e+00> : vector<16xf32>
    %62 = vector.multi_reduction <add>, %61, %cst_26 [0] : vector<8x16xf32> to vector<16xf32>
    %63 = vector.shape_cast %62 : vector<16xf32> to vector<1x16xf32>
    %64 = tpu.reciprocal %63 {approx = true} : vector<1x16xf32> -> vector<1x16xf32>
    %cst_27 = arith.constant 6.250000e-02 : f32
    %65 = vector.broadcast %cst_27 : f32 to vector<1x16xf32>
    %66 = arith.mulf %65, %64 : vector<1x16xf32>
    %67 = vector.broadcast %66 : vector<1x16xf32> to vector<8x16xf32>
    %68 = arith.mulf %61, %67 : vector<8x16xf32>
    %cst_28 = arith.constant dense<0.000000e+00> : vector<8xf32>
    %69 = vector.multi_reduction <add>, %68, %cst_28 [1] : vector<8x16xf32> to vector<8xf32>
    %70 = vector.shape_cast %69 : vector<8xf32> to vector<8x1xf32>
    %71 = tpu.reciprocal %70 {approx = true} : vector<8x1xf32> -> vector<8x1xf32>
    %cst_29 = arith.constant 1.250000e-01 : f32
    %72 = vector.broadcast %cst_29 : f32 to vector<8x1xf32>
    %73 = arith.mulf %72, %71 : vector<8x1xf32>
    %74 = vector.broadcast %73 : vector<8x1xf32> to vector<8x16xf32>
    %75 = arith.mulf %68, %74 : vector<8x16xf32>
    %cst_30 = arith.constant dense<0.000000e+00> : vector<16xf32>
    %76 = vector.multi_reduction <add>, %75, %cst_30 [0] : vector<8x16xf32> to vector<16xf32>
    %77 = vector.shape_cast %76 : vector<16xf32> to vector<1x16xf32>
    %78 = tpu.reciprocal %77 {approx = true} : vector<1x16xf32> -> vector<1x16xf32>
    %cst_31 = arith.constant 6.250000e-02 : f32
    %79 = vector.broadcast %cst_31 : f32 to vector<1x16xf32>
    %80 = arith.mulf %79, %78 : vector<1x16xf32>
    %81 = vector.broadcast %80 : vector<1x16xf32> to vector<8x16xf32>
    %82 = arith.mulf %75, %81 : vector<8x16xf32>
    %cst_32 = arith.constant dense<0.000000e+00> : vector<8xf32>
    %83 = vector.multi_reduction <add>, %82, %cst_32 [1] : vector<8x16xf32> to vector<8xf32>
    %84 = vector.shape_cast %83 : vector<8xf32> to vector<8x1xf32>
    %85 = tpu.reciprocal %84 {approx = true} : vector<8x1xf32> -> vector<8x1xf32>
    %cst_33 = arith.constant 1.250000e-01 : f32
    %86 = vector.broadcast %cst_33 : f32 to vector<8x1xf32>
    %87 = arith.mulf %86, %85 : vector<8x1xf32>
    %88 = vector.broadcast %87 : vector<8x1xf32> to vector<8x16xf32>
    %89 = arith.mulf %82, %88 : vector<8x16xf32>
    %cst_34 = arith.constant dense<0.000000e+00> : vector<16xf32>
    %90 = vector.multi_reduction <add>, %89, %cst_34 [0] : vector<8x16xf32> to vector<16xf32>
    %91 = vector.shape_cast %90 : vector<16xf32> to vector<1x16xf32>
    %92 = tpu.reciprocal %91 {approx = true} : vector<1x16xf32> -> vector<1x16xf32>
    %cst_35 = arith.constant 6.250000e-02 : f32
    %93 = vector.broadcast %cst_35 : f32 to vector<1x16xf32>
    %94 = arith.mulf %93, %92 : vector<1x16xf32>
    %95 = vector.broadcast %94 : vector<1x16xf32> to vector<8x16xf32>
    %96 = arith.mulf %89, %95 : vector<8x16xf32>
    %cst_36 = arith.constant dense<0.000000e+00> : vector<8xf32>
    %97 = vector.multi_reduction <add>, %96, %cst_36 [1] : vector<8x16xf32> to vector<8xf32>
    %98 = vector.shape_cast %97 : vector<8xf32> to vector<8x1xf32>
    %99 = tpu.reciprocal %98 {approx = true} : vector<8x1xf32> -> vector<8x1xf32>
    %100 = vector.broadcast %99 : vector<8x1xf32> to vector<8x16xf32>
    %101 = arith.mulf %96, %100 : vector<8x16xf32>
    %102 = arith.mulf %101, %46 : vector<8x16xf32>
    %103 = vector.shape_cast %102 : vector<8x16xf32> to vector<1x8x16xf32>
    %cst_37 = arith.constant dense<0.000000e+00> : vector<1xf32>
    %104 = vector.multi_reduction <add>, %103, %cst_37 [1, 2] : vector<1x8x16xf32> to vector<1xf32>
    %105 = vector.shape_cast %104 : vector<1xf32> to vector<1x1x1xf32>
    %106 = vector.extract %105[0, 0, 0] : f32 from vector<1x1x1xf32>
    %cst_38 = arith.constant 0.000000e+00 : f32
    %107 = arith.subf %cst_38, %106 : f32
    %cst_39 = arith.constant 1.250000e-01 : f32
    %108 = arith.mulf %107, %cst_39 : f32
    %c0_40 = arith.constant 0 : index
    %c0_41 = arith.constant 0 : index
    %109 = memref.load %arg7[%c0_40, %c0_41] : memref<1x1xf32, #tpu.memory_space<smem>>
    memref.store %108, %arg7[%c0_40, %c0_41] : memref<1x1xf32, #tpu.memory_space<smem>>
    return
  }
}

</mosaic_0001>

<bundles_post_ra>
// kernel: tpu_custom_call.1
= control target key start
LH: loop header
LB: loop body
LE: loop exit
PB: predicated region body
PF: predicated region fallthrough
CT: control target
= control target key end

     0   :  { %v575_v3 = vmov 0.0|0.0   ;;  %vm576_vm0 = vmmov 0   ;;  %v577_v6 = vmov 0.0   ;;  %s705_s0 = inlined_call_operand.vmem [shape: f32[8,32], index: 0, kind: input, shape index: {}]   ;;  %s706_s1 = inlined_call_operand.vmem [shape: f32[8,32], index: 1, kind: input, shape index: {}]   ;;  %s707_s2 = inlined_call_operand.vmem [shape: f32[32,64], index: 2, kind: input, shape index: {}]   ;;  %s708_s3 = inlined_call_operand.vmem [shape: f32[1,64], index: 3, kind: input, shape index: {}]   ;;  %s709_s4 = inlined_call_operand.vmem [shape: f32[64,32], index: 4, kind: input, shape index: {}]   ;;  %s710_s5 = inlined_call_operand.vmem [shape: f32[1,32], index: 5, kind: input, shape index: {}]   ;;  %s711_s6 = inlined_call_operand.vmem [shape: f32[16,32], index: 6, kind: input, shape index: {}]   ;;  %s712_s7 = inlined_call_operand.hbm [shape: f32[1,1], index: 7, kind: output, shape index: {}]  }
   0x1   :  { %v46_v0 = vld [vmem:[%s707_s2] sm:$0xff]  ;;  %v47_v1 = vld [vmem:[%s707_s2 + $0x8] sm:$0xff]  ;;  %v48_v2 = vld [vmem:[%s707_s2 + $0x10] sm:$0xff]  ;;  %501 = vmatprep.subr.bf16.mxu0 %v575_v3  ;;  %472 = vmatprep.mubr.msk.f32.mxu0 %vm576_vm0, %v577_v6 }
   0x2   :  { %v502_v4 = vpack.c.bf16 %v47_v1, %v46_v0  ;;  %v49_v5 = vld [vmem:[%s707_s2 + $0x18] sm:$0xff]  ;;  %v131_v7 = vld [vmem:[%s709_s4] sm:$0xff]  ;;  %507 = vmatprep.subr.bf16.mxu1 %v575_v3  ;;  %v132_v8 = vld [vmem:[%s709_s4 + $0x8] sm:$0xff]  ;;  %491 = vmatprep.mubr.msk.f32.mxu1 %vm576_vm0, %v577_v6 }
   0x3   :  { %v133_v9 = vld [vmem:[%s709_s4 + $0x10] sm:$0xff]  ;;  %v134_v10 = vld [vmem:[%s709_s4 + $0x18] sm:$0xff]  ;;  %v505_v11 = vpack.c.bf16 %v49_v5, %v48_v2  ;;  %v508_v12 = vpack.c.bf16 %v132_v8, %v131_v7 }
   0x4   :  { %503 = vmatpush3.bf16.msra.mxu0 %v502_v4 }
   0x5   :  { %504 = vmatprep.subr.bf16.mxu0 %v575_v3 }
   0x6   :  { %12 = vsyncpa [#allocation3], 0  ;;  %509 = vmatpush3.bf16.msra.mxu1 %v508_v12  ;;  %v511_v13 = vpack.c.bf16 %v134_v10, %v133_v9  ;;  %v135_v14 = vld [vmem:[%s709_s4 + $0x20] sm:$0xff]  ;;  %v136_v15 = vld [vmem:[%s709_s4 + $0x28] sm:$0xff]  ;;  %vm33_vm1 = vcmask 261120   ;;  %vm146_vm2 = vcmask 523264  }
   0x7   :  { %510 = vmatprep.subr.bf16.mxu1 %v575_v3  ;;  %v27_v16 = vld [vmem:[%s705_s0] sm:$0xff]  ;;  %v514_v17 = vpack.c.bf16 %v136_v15, %v135_v14  ;;  %v137_v18 = vld [vmem:[%s709_s4 + $0x30] sm:$0xff]  ;;  %v138_v19 = vld [vmem:[%s709_s4 + $0x38] sm:$0xff]  ;;  %vm322_vm4 = vcmask 130048   ;;  %s563_s14 = scalar_lea.hbm %s712_s7, 16 }
   0x8   :  { %506 = vmatpush3.bf16.msra.mxu0 %v505_v11  ;;  %v517_v20 = vpack.c.bf16 %v138_v19, %v137_v18  ;;  %v29_v21 = vld [vmem:[%s711_s6] sm:$0xff]  ;;  %v30_v22 = vld [vmem:[%s711_s6 + $0x8] sm:$0xff]  ;;  %vm520_vm3 = vmpackc.low %vm33_vm1, %vm33_vm1  ;;  %p564_p0 = scmp.ne.s32.totalorder %s712_s7, %s563_s14  ;;  %p567_p1 = scmp.lt.u32.totalorder %s563_s14, %s712_s7 }
   0x9   :  { %v31_v23 = vmul.f32 %v29_v21, %v29_v21  ;;  %v32_v24 = vmul.f32 %v30_v22, %v30_v22  ;;  %v438_v27 = vld [vmem:[%s708_s3] ss:$0 sm:$0xff] }
   0xa   :  { %512 = vmatpush3.bf16.msra.mxu1 %v511_v13  ;;  %v440_v33 = vld [vmem:[%s710_s5] ss:$0 sm:$0xff]  ;;  %p569_p2 = pnand %p567_p1, %p564_p0 }
   0xb   :  { %473 = vmatmul.mubr.msk.f32.vlgmr.msra.gmra.mrb[0].mxu0 %vm33_vm1, %v27_v16  ;;  %513 = vmatprep.subr.bf16.mxu1 %v575_v3  ;;  %v34_v25 = vsel %vm33_vm1, %v31_v23, 0.0  ;;  %v37_v26 = vsel %vm33_vm1, %v32_v24, 0.0  ;;  %v28_v35 = vld [vmem:[%s706_s1] sm:$0xff] }
   0xc   :  { %35 = vadd.xlane.f32.xlu0 %v34_v25  ;;  %v221_v40 = vmul.f32 %v28_v35, %v28_v35 }
   0xe   :  { %515 = vmatpush3.bf16.msra.mxu1 %v514_v17  ;;  %v225_v44 = vsel %vm33_vm1, %v221_v40, 0.0 }
   0xf   :  { %516 = vmatprep.subr.bf16.mxu1 %v575_v3 }
  0x10   :  { %38 = vadd.xlane.f32.xlu0 %v37_v26 }
  0x12   :  { %518 = vmatpush3.bf16.msra.mxu1 %v517_v20 }
  0x99   :  { %v36_v32 = vpop.xlane.xlu0 %35 }
  0x9a   :  { %v40_v41 = vmax.f32 %v36_v32, 1e-24 }
  0x9c   :  { %535 = vrsqrt.f32 %v40_v41 }
  0x9d   :  { %v39_v38 = vpop.xlane.xlu0 %38 }
  0x9e   :  { %v41_v43 = vmax.f32 %v39_v38, 1e-24 }
  0xa0   :  { %537 = vrsqrt.f32 %v41_v43 }
  0xa6   :  { %v536_v45 = vpop.eup %535 }
  0xa7   :  { %v44_v47 = vmul.f32 %v536_v45, %v29_v21 }
  0xaa   :  { %v538_v46 = vpop.eup %537 }
  0xab   :  { %v45_v48 = vmul.f32 %v538_v46, %v30_v22 }
  0xad   :  { %v519_v49 = vpack.c.bf16 %v45_v48, %v44_v47 }
  0xaf   :  { %521 = vmatprep.subr.msk.bf16.mxu0 %vm520_vm3, %v519_v49 }
  0xb0   :  { %524 = vmatpush3.bf16.xpose.msk.msra.mxu0 %vm520_vm3, %v519_v49 }
  0xde   :  { %v126_v28 = vpop.f32.mrb[0].mxu0 }
  0xdf   :  { %v127_v29 = vadd.f32 %v438_v27, %v126_v28  ;;  %v474_v30 = vpop.f32.mrb[1].mxu0 }
  0xe1   :  { %v130_v31 = vmax.f32 %v127_v29, 0.0 }
  0xe3   :  { %492 = vmatmul.mubr.msk.f32.vlgmr.msra.gmra.mrb[0].mxu1 %vm146_vm2, %v130_v31 }
 0x1b6   :  { %v216_v34 = vpop.f32.mrb[0].mxu1 }
 0x1b7   :  { %v217_v36 = vadd.f32 %v440_v33, %v216_v34  ;;  %v493_v37 = vpop.f32.mrb[1].mxu1 }
 0x1b9   :  { %v220_v39 = vmul.f32 %v217_v36, %v217_v36 }
 0x1bb   :  { %v222_v42 = vsel %vm33_vm1, %v220_v39, 0.0 }
 0x1bc   :  { %223 = vadd.xlane.f32.xlu1 %v222_v42 }
 0x1c0   :  { %226 = vadd.xlane.f32.xlu1 %v225_v44 }
 0x249   :  { %v224_v50 = vpop.xlane.xlu1 %223 }
 0x24a   :  { %v228_v51 = vmax.f32 %v224_v50, 1e-24 }
 0x24c   :  { %539 = vrsqrt.f32 %v228_v51 }
 0x24d   :  { %v227_v52 = vpop.xlane.xlu1 %226 }
 0x24e   :  { %v229_v53 = vmax.f32 %v227_v52, 1e-24 }
 0x250   :  { %541 = vrsqrt.f32 %v229_v53 }
 0x256   :  { %v540_v54 = vpop.eup %539 }
 0x257   :  { %v232_v55 = vmul.f32 %v540_v54, %v217_v36 }
 0x259   :  { %498 = vmatprep.mubr.msk.f32.mxu0 %vm33_vm1, %v232_v55 }
 0x25a   :  { %v542_v56 = vpop.eup %541 }
 0x25b   :  { %v233_v57 = vmul.f32 %v542_v56, %v28_v35 }
 0x25d   :  { %499 = vmatmul.mubr.msk.f32.vlgmr.msra.gmra.mrb[2].mxu0 %vm33_vm1, %v233_v57 }
 0x330   :  { %v500_v58 = vpop.f32.mrb[2].mxu0 }
 0x331   :  { %v335_v59 = vmul.f32 10.0, %v500_v58  ;;  %v312_v60 = vpop.f32.mrb[3].mxu0 }
 0x332   :  { %v321_v30 = vmul.f32 10.0, %v312_v60 }
 0x333   :  { %v336_v61 = vsel %vm322_vm4, %v335_v59, -inf }
 0x334   :  { %337 = vmax.xlane.f32.xlu0 %v336_v61  ;;  %v323_v32 = vsel %vm322_vm4, %v321_v30, -inf }
 0x3c1   :  { %v338_v62 = vpop.xlane.xlu0 %337 }
 0x3c2   :  { %v339_v63 = vrot.slane %v338_v62, 4 }
 0x3c4   :  { %v340_v0 = vmax.f32 %v338_v62, %v339_v63 }
 0x3c6   :  { %v341_v1 = vrot.slane %v340_v0, 2 }
 0x3c8   :  { %v342_v2 = vmax.f32 %v340_v0, %v341_v1 }
 0x3ca   :  { %v343_v3 = vrot.slane %v342_v2, 1 }
 0x3cc   :  { %v344_v4 = vmax.f32 %v342_v2, %v343_v3 }
 0x3ce   :  { %525 = vpush %v344_v4 }
 0x3ff   :  { %s526_s1 = spop %525 }
 0x400   :  { %v346_v5 = vstv %s526_s1 }
 0x401   :  { %v347_v6 = vsub.f32 %v335_v59, %v346_v5 }
 0x403   :  { %v348_v7 = vmul.f32 1.442695, %v347_v6 }
 0x405   :  { %543 = vpow2.f32 %v348_v7 }
 0x40f   :  { %v544_v8 = vpop.eup %543 }
 0x410   :  { %v350_v9 = vsel %vm322_vm4, %v544_v8, 0.0 }
 0x411   :  { %351 = vadd.xlane.f32.xlu1 %v350_v9 }
 0x49e   :  { %v352_v10 = vpop.xlane.xlu1 %351 }
 0x49f   :  { %v353_v11 = vrot.slane %v352_v10, 4 }
 0x4a1   :  { %v354_v12 = vadd.f32 %v353_v11, %v352_v10 }
 0x4a3   :  { %v355_v13 = vrot.slane %v354_v12, 2 }
 0x4a5   :  { %v356_v14 = vadd.f32 %v355_v13, %v354_v12 }
 0x4a7   :  { %v357_v15 = vrot.slane %v356_v14, 1 }
 0x4a9   :  { %v358_v16 = vadd.f32 %v357_v15, %v356_v14 }
 0x4ab   :  { %527 = vpush %v358_v16 }
 0x4dc   :  { %s528_s3 = spop %527 }
 0x4dd   :  { %v360_v17 = vstv %s528_s3 }
 0x4de   :  { %545 = vrcp.f32 %v360_v17 }
 0x4e8   :  { %v546_v18 = vpop.eup %545 }
 0x4e9   :  { %v362_v19 = vmul.f32 %v546_v18, %v544_v8 }
 0x4eb   :  { %v363_v20 = vsel %vm322_vm4, %v362_v19, 0.0 }
 0x4ec   :  { %v364_v21 = vrot.slane %v363_v20, 4 }
 0x4ee   :  { %v365_v22 = vadd.f32 %v364_v21, %v363_v20 }
 0x4f0   :  { %v366_v23 = vrot.slane %v365_v22, 2 }
 0x4f2   :  { %v367_v24 = vadd.f32 %v366_v23, %v365_v22 }
 0x4f4   :  { %v368_v25 = vrot.slane %v367_v24, 1 }
 0x4f6   :  { %v369_v26 = vadd.f32 %v368_v25, %v367_v24 }
 0x4f8   :  { %547 = vrcp.f32 %v369_v26 }
 0x502   :  { %v548_v27 = vpop.eup %547 }
 0x503   :  { %v371_v28 = vmul.f32 0.0625, %v548_v27 }
 0x505   :  { %v372_v29 = vmul.f32 %v371_v28, %v362_v19 }
 0x507   :  { %v373_v31 = vsel %vm322_vm4, %v372_v29, 0.0 }
 0x508   :  { %374 = vadd.xlane.f32.xlu0 %v373_v31 }
 0x50c   :  { %324 = vmax.xlane.f32.xlu0 %v323_v32 }
 0x595   :  { %v375_v33 = vpop.xlane.xlu0 %374 }
 0x596   :  { %549 = vrcp.f32 %v375_v33 }
 0x599   :  { %v325_v42 = vpop.xlane.xlu0 %324 }
 0x59a   :  { %v326_v44 = vsub.f32 %v321_v30, %v325_v42 }
 0x59c   :  { %v327_v46 = vmul.f32 1.442695, %v326_v44 }
 0x5a0   :  { %v550_v34 = vpop.eup %549 }
 0x5a1   :  { %v377_v35 = vmul.f32 0.125, %v550_v34 }
 0x5a3   :  { %v378_v36 = vmul.f32 %v377_v35, %v372_v29 }
 0x5a5   :  { %v379_v37 = vsel %vm322_vm4, %v378_v36, 0.0 }
 0x5a6   :  { %v380_v38 = vrot.slane %v379_v37, 4 }
 0x5a8   :  { %v381_v39 = vadd.f32 %v380_v38, %v379_v37 }
 0x5aa   :  { %v382_v40 = vrot.slane %v381_v39, 2 }
 0x5ac   :  { %v383_v41 = vadd.f32 %v382_v40, %v381_v39 }
 0x5ae   :  { %v384_v43 = vrot.slane %v383_v41, 1 }
 0x5b0   :  { %v385_v45 = vadd.f32 %v384_v43, %v383_v41 }
 0x5b2   :  { %551 = vrcp.f32 %v385_v45 }
 0x5b3   :  { %553 = vpow2.f32 %v327_v46 }
 0x5bc   :  { %v552_v47 = vpop.eup %551 }
 0x5bd   :  { %v387_v48 = vmul.f32 0.0625, %v552_v47  ;;  %v554_v51 = vpop.eup %553 }
 0x5be   :  { %v329_v52 = vsel %vm322_vm4, %v554_v51, 0.0 }
 0x5bf   :  { %v388_v49 = vmul.f32 %v387_v48, %v378_v36 }
 0x5c1   :  { %v389_v50 = vsel %vm322_vm4, %v388_v49, 0.0 }
 0x5c2   :  { %390 = vadd.xlane.f32.xlu1 %v389_v50 }
 0x5c6   :  { %330 = vadd.xlane.f32.xlu1 %v329_v52 }
 0x64f   :  { %v391_v53 = vpop.xlane.xlu1 %390 }
 0x650   :  { %555 = vrcp.f32 %v391_v53 }
 0x653   :  { %v331_v4 = vpop.xlane.xlu1 %330 }
 0x65a   :  { %v556_v54 = vpop.eup %555 }
 0x65b   :  { %v393_v55 = vmul.f32 0.125, %v556_v54 }
 0x65d   :  { %v394_v56 = vmul.f32 %v393_v55, %v388_v49 }
 0x65f   :  { %v395_v57 = vsel %vm322_vm4, %v394_v56, 0.0 }
 0x660   :  { %v396_v58 = vrot.slane %v395_v57, 4 }
 0x662   :  { %v397_v59 = vadd.f32 %v396_v58, %v395_v57 }
 0x664   :  { %v398_v60 = vrot.slane %v397_v59, 2 }
 0x666   :  { %v399_v61 = vadd.f32 %v398_v60, %v397_v59 }
 0x668   :  { %v400_v62 = vrot.slane %v399_v61, 1 }
 0x66a   :  { %v401_v63 = vadd.f32 %v400_v62, %v399_v61 }
 0x66c   :  { %557 = vrcp.f32 %v401_v63 }
 0x66d   :  { %559 = vlog2.f32 %v331_v4 }
 0x676   :  { %v558_v0 = vpop.eup %557 }
 0x677   :  { %v403_v1 = vmul.f32 0.0625, %v558_v0  ;;  %v560_v6 = vpop.eup %559 }
 0x678   :  { %v333_v7 = vmul.f32 0.6931472, %v560_v6 }
 0x679   :  { %v404_v2 = vmul.f32 %v403_v1, %v394_v56 }
 0x67a   :  { %v334_v9 = vsub.f32 %v326_v44, %v333_v7 }
 0x67b   :  { %v405_v3 = vsel %vm322_vm4, %v404_v2, 0.0 }
 0x67c   :  { %406 = vadd.xlane.f32.xlu0 %v405_v3 }
 0x709   :  { %v407_v5 = vpop.xlane.xlu0 %406 }
 0x70a   :  { %561 = vrcp.f32 %v407_v5 }
 0x714   :  { %v562_v8 = vpop.eup %561 }
 0x715   :  { %v409_v10 = vmul.f32 %v562_v8, %v404_v2 }
 0x717   :  { %v410_v11 = vmul.f32 %v409_v10, %v334_v9 }
 0x719   :  { %v411_v12 = vsel %vm322_vm4, %v410_v11, 0.0 }
 0x71a   :  { %412 = vadd.xlane.f32.xlu1 %v411_v12 }
 0x7a7   :  { %v413_v13 = vpop.xlane.xlu1 %412 }
 0x7a8   :  { %v414_v14 = vrot.slane %v413_v13, 4 }
 0x7aa   :  { %v415_v15 = vadd.f32 %v414_v14, %v413_v13 }
 0x7ac   :  { %v416_v16 = vrot.slane %v415_v15, 2 }
 0x7ae   :  { %v417_v17 = vadd.f32 %v416_v16, %v415_v15 }
 0x7b0   :  { %v418_v18 = vrot.slane %v417_v17, 1 }
 0x7b2   :  { %v419_v19 = vadd.f32 %v418_v18, %v417_v17 }
 0x7b4   :  { %529 = vpush %v419_v19 }
 0x7e5   :  { %s530_s5 = spop %529 }
 0x7e6   :  { %s421_s10 = ssub.f32 0.0, %s530_s5 }
 0x7e8   :  { %s422_s11 = smul.f32 0.125, %s421_s10 }
 0x7ea   :  { %424 = sst [smem:[#allocation2]] %s422_s11 }
 0x7eb   :  { %572 = shalt.err (!%p569_p2)
}
 0x7ec   :  { %s578_s18 = smov [#allocation2]  }
 0x7ed   :  { %432 = dma.smem_to_hbm %s578_s18, 16, %s712_s7, [#allocation3]  }
 0x7ee   :  { %573 = dma.done.wait [#allocation3], 16  }
 0x7ef   :  { %574 = vsyncadd [#allocation3], 4294967280 }
 0x7f0   :  { %436 = sfence }
 0x7f1   :  { %437 = vsyncpa [#allocation3], 1 }

</bundles_post_ra>
